<compile_context>
chip_gen: v7x
topology: tpu7x:2x2x1
jax: 0.10.0
libtpu: 0.0.40
codegen_flags: <defaults>
</compile_context>

<pallas_src>
import functools

import numpy as np
import jax
import jax.numpy as jnp
from jax.experimental import pallas as pl
from jax.experimental.pallas import tpu as pltpu


def _round_up(x, m):
    return -(-x // m) * m


def _vmem_budgets():
    """Generation-aware (input-tile budget, scoped vmem limit) in bytes.

    v5e/v6e report ~128 MiB physical VMEM -> 64 MiB tile budget / 96 MiB limit.
    v7x reports 64 MiB  -> 32 MiB tile budget / 48 MiB limit.
    Falls back to the v7x-safe numbers if the query is unavailable.
    """
    cap = 64 << 20
    try:
        cap = int(pltpu.get_tpu_info().vmem_capacity_bytes)
    except Exception:
        pass
    limit = min((cap * 3) // 4, 96 << 20)
    budget = min(cap // 2, 64 << 20)
    return budget, limit


# --------------------------------------------------------------------------
# Heatmap MSE loss kernel
#   mask = (gt.sum(H,W) > 0); loss = sum(mean_{H,W}((p-g)^2) * mask) / sum(mask)
# Grid: (row tiles [parallel], hw tiles [arbitrary, reduction]).
# --------------------------------------------------------------------------
def _hm_mse_kernel(p_ref, g_ref, o_ref, sq_acc, g_acc, *,
                   inv_hw, rows, hw, row_tile, hw_tile):
    i = pl.program_id(0)
    k = pl.program_id(1)

    @pl.when(k == 0)
    def _():
        sq_acc[...] = jnp.zeros_like(sq_acc)
        g_acc[...] = jnp.zeros_like(g_acc)

    p = p_ref[...].astype(jnp.float32)                 # (row_tile, hw_tile)
    g = g_ref[...].astype(jnp.float32)
    if hw % hw_tile != 0:
        # mask garbage lanes of a partial last hw tile (select, so NaN/Inf in
        # the undefined padded region can never poison the accumulators)
        lane_ids = k * hw_tile + jax.lax.broadcasted_iota(
            jnp.int32, (row_tile, hw_tile), 1)
        lane_valid = lane_ids < hw
        d = jnp.where(lane_valid, p - g, 0.0)
        g = jnp.where(lane_valid, g, 0.0)
    else:
        d = p - g
    sq_acc[...] += jnp.sum(d * d, axis=-1, keepdims=True)
    g_acc[...] += jnp.sum(g, axis=-1, keepdims=True)

    @pl.when(k == pl.num_programs(1) - 1)
    def _():
        mean_sq = sq_acc[...] * inv_hw                              # (row_tile, 1)
        chan_mask = (g_acc[...] > 0.0).astype(jnp.float32)
        if rows % row_tile != 0:
            # select (not multiply): garbage rows of a partial last row tile
            # may hold NaN and must never reach the sums
            row_ids = i * row_tile + jax.lax.broadcasted_iota(
                jnp.int32, (row_tile, 1), 0)
            valid = row_ids < rows
            num = jnp.sum(jnp.where(valid, mean_sq * chan_mask, 0.0))
            den = jnp.sum(jnp.where(valid, chan_mask, 0.0))
        else:
            num = jnp.sum(mean_sq * chan_mask)
            den = jnp.sum(chan_mask)
        # lane-dense partial output: lane 0 = numerator, lane 1 = denominator
        lane = jax.lax.broadcasted_iota(jnp.int32, (1, 1, 128), 2)
        o_ref[...] = jnp.where(lane == 0, num, 0.0) + jnp.where(lane == 1, den, 0.0)


def heatmap_mse_loss(pred, gt):
    B, J, H, W = pred.shape
    hw = H * W
    rows = B * J
    in_budget, vmem_limit = _vmem_budgets()
    # 2 inputs (pred, gt), each double-buffered by the auto-pipeline
    per_elem = 2 * (pred.dtype.itemsize + gt.dtype.itemsize)

    if 8 * hw * per_elem <= in_budget:
        # whole H*W extent fits on lanes for >= 8 rows: single-step hw axis
        hw_tile = hw
        if rows < 8:
            row_tile = rows                       # full-extent dim is always legal
        else:
            max_rows = max(8, (in_budget // (hw * per_elem)) // 8 * 8)
            row_tile = min(max_rows, 2048, _round_up(rows, 8))
            if rows >= 9:
                # guarantee >= 2 row tiles: feeds both v7x TensorCores on the
                # "parallel" axis and keeps the DMA/compute pipeline non-trivial
                row_tile = min(row_tile, _round_up((rows + 1) // 2, 8))
    else:
        # very large heatmaps: tile hw (reduction axis) and accumulate in VMEM,
        # so the double-buffered input tiles always respect the VMEM budget
        row_tile = 8 if rows >= 8 else rows
        hw_tile = max(128, (in_budget // (max(row_tile, 8) * per_elem)) // 128 * 128)

    n_row = -(-rows // row_tile)
    n_hw = -(-hw // hw_tile)

    p2 = pred.reshape(rows, hw)    # no pad, no dtype cast
    g2 = gt.reshape(rows, hw)

    kernel = functools.partial(
        _hm_mse_kernel, inv_hw=1.0 / float(hw), rows=rows, hw=hw,
        row_tile=row_tile, hw_tile=hw_tile)
    part = pl.pallas_call(
        kernel,
        out_shape=jax.ShapeDtypeStruct((n_row, 1, 128), jnp.float32),
        grid_spec=pltpu.PrefetchScalarGridSpec(
            num_scalar_prefetch=0,
            grid=(n_row, n_hw),
            in_specs=[
                pl.BlockSpec((row_tile, hw_tile), lambda i, k: (i, k)),
                pl.BlockSpec((row_tile, hw_tile), lambda i, k: (i, k)),
            ],
            out_specs=pl.BlockSpec((1, 1, 128), lambda i, k: (i, 0, 0)),
            scratch_shapes=[pltpu.VMEM((row_tile, 1), jnp.float32),
                            pltpu.VMEM((row_tile, 1), jnp.float32)],
        ),
        compiler_params=pltpu.CompilerParams(
            dimension_semantics=("parallel", "arbitrary"),
            vmem_limit_bytes=vmem_limit,
        ),
    )(p2, g2)
    # final tiny reduction + division in JAX (keeps the grid fully parallel)
    return jnp.sum(part[:, 0, 0]) / jnp.sum(part[:, 0, 1])


# --------------------------------------------------------------------------
# Associative-embedding (push/pull, loss_type='exp') kernel.
# Grid: (B,), whole tag row resident in VMEM per batch element.
# --------------------------------------------------------------------------
def _outer(a, b):
    # (P, 1) x (P, 1) -> (P, P): out[i, j] = a[i, 0] * b[j, 0]   (no transpose)
    return jax.lax.dot_general(a, b, (((1,), (1,)), ((), ())),
                               preferred_element_type=jnp.float32)


def _ae_kernel(tags_ref, idx_ref, vis_ref, out_ref, *, num_people, joints_per, lanes):
    P, K = num_people, joints_per
    PJ = P * K

    tags = tags_ref[0].astype(jnp.float32)             # (R, lanes)
    R = tags.shape[0]
    idx = idx_ref[0]                                    # (PJ, 1) int32 flat indices
    vis = (vis_ref[0] > 0).astype(jnp.float32)          # (PJ, 1)

    # --- two-stage gather of the PJ tag values (O(PJ*N/128) + one matmul) ----
    row_idx = idx // lanes                              # (PJ, 1)
    lane_idx = idx - row_idx * lanes                    # (PJ, 1)
    row_iota = jax.lax.broadcasted_iota(jnp.int32, (PJ, R), 1)
    row_onehot = (row_iota == row_idx).astype(jnp.float32)            # (PJ, R)
    rows_g = jnp.dot(row_onehot, tags,
                     preferred_element_type=jnp.float32)              # (PJ, lanes)
    lane_iota = jax.lax.broadcasted_iota(jnp.int32, (PJ, lanes), 1)
    t = jnp.sum(jnp.where(lane_iota == lane_idx, rows_g, 0.0),
                axis=-1, keepdims=True)                               # (PJ, 1)

    # --- per-person moments via a single fused (P, PJ) @ (PJ, 3) matmul ------
    rp = jax.lax.broadcasted_iota(jnp.int32, (P, PJ), 0)
    cj = jax.lax.broadcasted_iota(jnp.int32, (P, PJ), 1)
    G = ((cj >= rp * K) & (cj < (rp + 1) * K)).astype(jnp.float32)
    col = jax.lax.broadcasted_iota(jnp.int32, (PJ, 3), 1)
    tpow = jnp.where(col == 0, 1.0, jnp.where(col == 1, t, t * t))    # (PJ, 3)
    mom = jnp.dot(G, vis * tpow, preferred_element_type=jnp.float32)  # (P, 3)
    nvis = mom[:, 0:1]
    s1 = mom[:, 1:2]
    s2 = mom[:, 2:3]

    valid = (nvis > 0.0).astype(jnp.float32)
    safe = jnp.maximum(nvis, 1.0)
    m = s1 / safe                                                     # person mean tag
    # one-pass variance, clamped at 0 to guard fp cancellation
    pull_per = jnp.maximum(s2 - 2.0 * m * s1 + m * m * nvis, 0.0) / safe
    pull_sum = jnp.sum(pull_per * valid)
    num_tags = jnp.sum(valid)

    # --- pairwise push: sum_{p,q valid} exp(-(m_p - m_q)^2) - num_tags -------
    ones = jnp.ones((P, 1), jnp.float32)
    msq = m * m
    diffsq = _outer(msq, ones) - 2.0 * _outer(m, m) + _outer(ones, msq)
    pairmask = _outer(valid, valid)
    push_sum = jnp.sum(jnp.exp(-diffsq) * pairmask)

    denom = jnp.maximum((num_tags - 1.0) * num_tags, 1.0)
    push = jnp.where(num_tags >= 2.0, (push_sum - num_tags) * 0.5 / denom, 0.0)
    pull = pull_sum / jnp.maximum(num_tags, 1.0)

    # lane-dense output row: lane 0 = push, lane 1 = pull
    lane = jax.lax.broadcasted_iota(jnp.int32, (1, 1, 128), 2)
    out_ref[...] = jnp.where(lane == 0, push, 0.0) + jnp.where(lane == 1, pull, 0.0)


def ae_loss(tags_flat, joints_idx, joints_vis):
    B, N = tags_flat.shape
    _, P, K = joints_idx.shape
    PJ = P * K
    LANES = 128
    R = _round_up(N, LANES) // LANES
    pad = R * LANES - N

    # pad the flattened tag map to a multiple of 128 lanes (pad values are
    # only reachable from out-of-range indices and contribute 0)
    tags3 = tags_flat if pad == 0 else jnp.pad(tags_flat, ((0, 0), (0, pad)))
    tags3 = tags3.reshape(B, R, LANES)                  # native dtype
    idx3 = joints_idx.astype(jnp.int32).reshape(B, PJ, 1)
    vis3 = joints_vis.astype(jnp.int32).reshape(B, PJ, 1)

    _, vmem_limit = _vmem_budgets()
    # TODO(synk): for pathological PJ*N (one-hot + iota > ~vmem_limit) chunk the
    # row (R) axis with an accumulating grid dimension.
    kernel = functools.partial(_ae_kernel, num_people=P, joints_per=K, lanes=LANES)
    out = pl.pallas_call(
        kernel,
        out_shape=jax.ShapeDtypeStruct((B, 1, 128), jnp.float32),
        grid_spec=pltpu.PrefetchScalarGridSpec(
            num_scalar_prefetch=0,
            grid=(B,),
            in_specs=[
                pl.BlockSpec((1, R, LANES), lambda b: (b, 0, 0)),
                pl.BlockSpec((1, PJ, 1), lambda b: (b, 0, 0)),
                pl.BlockSpec((1, PJ, 1), lambda b: (b, 0, 0)),
            ],
            out_specs=pl.BlockSpec((1, 1, 128), lambda b: (b, 0, 0)),
        ),
        compiler_params=pltpu.CompilerParams(
            dimension_semantics=("parallel",),
            vmem_limit_bytes=vmem_limit,
        ),
    )(tags3, idx3, vis3)
    return out[:, 0, 0], out[:, 0, 1]


# --------------------------------------------------------------------------
# Module-equivalent forward (Heatmap_AE_loss, loss_type_HM='MSE', loss_type_AE='exp')
# --------------------------------------------------------------------------
def heatmap_ae_loss_forward(outputs, heatmaps, joints, num_joints,
                            heatmaps_loss_factor=1.0,
                            push_loss_factor=1.0,
                            pull_loss_factor=1.0):
    B = outputs.shape[0]
    hm_pred = outputs[:, :num_joints]
    tags_pred = outputs[:, num_joints:].reshape(B, -1)   # matches .view(B, -1, 1)
    hm_loss = heatmap_mse_loss(hm_pred, heatmaps) * heatmaps_loss_factor
    push, pull = ae_loss(tags_pred, joints[..., 0], joints[..., 1])
    return hm_loss, push * push_loss_factor, pull * pull_loss_factor


# --------------------------------------------------------------------------
# Pure numpy reference mirroring the PyTorch code
# --------------------------------------------------------------------------
def _reference(outputs, heatmaps, joints, num_joints):
    outputs = np.asarray(outputs, np.float32)
    heatmaps = np.asarray(heatmaps, np.float32)
    joints = np.asarray(joints)
    B = outputs.shape[0]
    hm_pred = outputs[:, :num_joints]
    mask = (heatmaps.sum(axis=(2, 3)) > 0).astype(np.float32)
    hm_loss = (((hm_pred - heatmaps) ** 2).mean(axis=(2, 3)) * mask).sum() / mask.sum()
    tags_pred = outputs[:, num_joints:].reshape(B, -1)
    pushes, pulls = [], []
    for b in range(B):
        tb = tags_pred[b]
        tag_means, pull = [], 0.0
        for person in joints[b]:
            tmp = [tb[j[0]] for j in person if j[1] > 0]
            if len(tmp) == 0:
                continue
            tmp = np.array(tmp, np.float32)
            mu = tmp.mean()
            tag_means.append(mu)
            pull += ((tmp - mu) ** 2).mean()
        n = len(tag_means)
        if n == 0:
            pushes.append(0.0); pulls.append(0.0)
        elif n == 1:
            pushes.append(0.0); pulls.append(pull / n)
        else:
            tarr = np.array(tag_means, np.float32)
            diff = tarr[:, None] - tarr[None, :]
            push = np.exp(-diff ** 2).sum() - n
            pushes.append(push / ((n - 1) * n) * 0.5)
            pulls.append(pull / n)
    return hm_loss, np.array(pushes, np.float32), np.array(pulls, np.float32)


if __name__ == "__main__":
    key = jax.random.PRNGKey(0)
    B, num_joints, tag_ch, H, W = 2, 4, 4, 16, 16
    C = num_joints + tag_ch
    P = 3                                   # max people per image
    N_tag = tag_ch * H * W

    k1, k2, k3 = jax.random.split(key, 3)
    outputs = jax.random.uniform(k1, (B, C, H, W), dtype=jnp.float32)
    heatmaps = jax.random.uniform(k2, (B, num_joints, H, W), dtype=jnp.float32)
    heatmaps = heatmaps.at[0, 1].set(0.0)   # exercise the per-channel mask

    idx = jax.random.randint(k3, (B, P, num_joints), 0, N_tag, dtype=jnp.int32)
    vis = jnp.array([[[1, 1, 1, 1], [1, 0, 1, 0], [0, 0, 0, 0]],
                     [[1, 1, 0, 0], [0, 0, 0, 0], [0, 0, 0, 0]]], dtype=jnp.int32)
    joints = jnp.stack([idx, vis], axis=-1)          # (B, P, num_joints, 2)

    hm_loss, push_loss, pull_loss = heatmap_ae_loss_forward(
        outputs, heatmaps, joints, num_joints)
    jax.block_until_ready((hm_loss, push_loss, pull_loss))

    ref_hm, ref_push, ref_pull = _reference(outputs, heatmaps, joints, num_joints)
    np.testing.assert_allclose(np.asarray(hm_loss), ref_hm, rtol=1e-4, atol=1e-5)
    np.testing.assert_allclose(np.asarray(push_loss), ref_push, rtol=1e-4, atol=1e-5)
    np.testing.assert_allclose(np.asarray(pull_loss), ref_pull, rtol=1e-4, atol=1e-5)

    print("KERNEL_OK")
</pallas_src>

<mosaic_0001>
module attributes {stable_mosaic.version = 11 : i64} {
  func.func @_hm_mse_kernel(%arg0: i32, %arg1: i32, %arg2: memref<8x256xf32, #tpu.memory_space<vmem>>, %arg3: memref<8x256xf32, #tpu.memory_space<vmem>>, %arg4: memref<1x1x128xf32, #tpu.memory_space<vmem>>, %arg5: memref<8x1xf32, #tpu.memory_space<vmem>>, %arg6: memref<8x1xf32, #tpu.memory_space<vmem>>) attributes {dimension_semantics = [#tpu.dimension_semantics<parallel>, #tpu.dimension_semantics<arbitrary>], iteration_bounds = array<i64: 1, 1>, scalar_prefetch = 0 : i64, scratch_operands = 2 : i64, tpu.core_type = #tpu.core_type<tc>, window_params = [{transform_indices = @transform_0, window_bounds = array<i64: 8, 256>}, {transform_indices = @transform_1, window_bounds = array<i64: 8, 256>}, {transform_indices = @transform_2, window_bounds = array<i64: 1, 1, 128>}]} {
    %c0_i32 = arith.constant 0 : i32
    %0 = arith.cmpi eq, %arg1, %c0_i32 : i32
    %1 = arith.extui %0 : i1 to i32
    %c0_i32_0 = arith.constant 0 : i32
    %2 = arith.cmpi ne, %1, %c0_i32_0 : i32
    scf.if %2 {
      %cst_15 = arith.constant 0.000000e+00 : f32
      %20 = vector.broadcast %cst_15 : f32 to vector<8x1xf32>
      %c0_16 = arith.constant 0 : index
      %c0_17 = arith.constant 0 : index
      %21 = vector.load %arg5[%c0_16, %c0_17] : memref<8x1xf32, #tpu.memory_space<vmem>>, vector<8x1xf32>
      tpu.vector_store %arg5[%c0_16, %c0_17], %20 {strides = array<i32>} : memref<8x1xf32, #tpu.memory_space<vmem>>, vector<8x1xf32>,
      %cst_18 = arith.constant 0.000000e+00 : f32
      %22 = vector.broadcast %cst_18 : f32 to vector<8x1xf32>
      %c0_19 = arith.constant 0 : index
      %c0_20 = arith.constant 0 : index
      %23 = vector.load %arg6[%c0_19, %c0_20] : memref<8x1xf32, #tpu.memory_space<vmem>>, vector<8x1xf32>
      tpu.vector_store %arg6[%c0_19, %c0_20], %22 {strides = array<i32>} : memref<8x1xf32, #tpu.memory_space<vmem>>, vector<8x1xf32>,
    } else {
    }
    %c0 = arith.constant 0 : index
    %c0_1 = arith.constant 0 : index
    %3 = vector.load %arg2[%c0, %c0_1] : memref<8x256xf32, #tpu.memory_space<vmem>>, vector<8x256xf32>
    %c0_2 = arith.constant 0 : index
    %c0_3 = arith.constant 0 : index
    %4 = vector.load %arg3[%c0_2, %c0_3] : memref<8x256xf32, #tpu.memory_space<vmem>>, vector<8x256xf32>
    %5 = arith.subf %3, %4 : vector<8x256xf32>
    %c0_4 = arith.constant 0 : index
    %c0_5 = arith.constant 0 : index
    %6 = vector.load %arg5[%c0_4, %c0_5] : memref<8x1xf32, #tpu.memory_space<vmem>>, vector<8x1xf32>
    %7 = arith.mulf %5, %5 : vector<8x256xf32>
    %cst = arith.constant dense<0.000000e+00> : vector<8xf32>
    %8 = vector.multi_reduction <add>, %7, %cst [1] : vector<8x256xf32> to vector<8xf32>
    %9 = vector.shape_cast %8 : vector<8xf32> to vector<8x1xf32>
    %10 = arith.addf %6, %9 : vector<8x1xf32>
    %c0_6 = arith.constant 0 : index
    %c0_7 = arith.constant 0 : index
    %11 = vector.load %arg5[%c0_6, %c0_7] : memref<8x1xf32, #tpu.memory_space<vmem>>, vector<8x1xf32>
    tpu.vector_store %arg5[%c0_6, %c0_7], %10 {strides = array<i32>} : memref<8x1xf32, #tpu.memory_space<vmem>>, vector<8x1xf32>,
    %c0_8 = arith.constant 0 : index
    %c0_9 = arith.constant 0 : index
    %12 = vector.load %arg6[%c0_8, %c0_9] : memref<8x1xf32, #tpu.memory_space<vmem>>, vector<8x1xf32>
    %cst_10 = arith.constant dense<0.000000e+00> : vector<8xf32>
    %13 = vector.multi_reduction <add>, %4, %cst_10 [1] : vector<8x256xf32> to vector<8xf32>
    %14 = vector.shape_cast %13 : vector<8xf32> to vector<8x1xf32>
    %15 = arith.addf %12, %14 : vector<8x1xf32>
    %c0_11 = arith.constant 0 : index
    %c0_12 = arith.constant 0 : index
    %16 = vector.load %arg6[%c0_11, %c0_12] : memref<8x1xf32, #tpu.memory_space<vmem>>, vector<8x1xf32>
    tpu.vector_store %arg6[%c0_11, %c0_12], %15 {strides = array<i32>} : memref<8x1xf32, #tpu.memory_space<vmem>>, vector<8x1xf32>,
    %c0_i32_13 = arith.constant 0 : i32
    %17 = arith.cmpi eq, %arg1, %c0_i32_13 : i32
    %18 = arith.extui %17 : i1 to i32
    %c0_i32_14 = arith.constant 0 : i32
    %19 = arith.cmpi ne, %18, %c0_i32_14 : i32
    scf.if %19 {
      %c0_15 = arith.constant 0 : index
      %c0_16 = arith.constant 0 : index
      %20 = vector.load %arg5[%c0_15, %c0_16] : memref<8x1xf32, #tpu.memory_space<vmem>>, vector<8x1xf32>
      %cst_17 = arith.constant 3.906250e-03 : f32
      %21 = vector.broadcast %cst_17 : f32 to vector<8x1xf32>
      %22 = arith.mulf %20, %21 : vector<8x1xf32>
      %c0_18 = arith.constant 0 : index
      %c0_19 = arith.constant 0 : index
      %23 = vector.load %arg6[%c0_18, %c0_19] : memref<8x1xf32, #tpu.memory_space<vmem>>, vector<8x1xf32>
      %cst_20 = arith.constant 0.000000e+00 : f32
      %24 = vector.broadcast %cst_20 : f32 to vector<8x1xf32>
      %25 = arith.cmpf ogt, %23, %24 : vector<8x1xf32>
      %26 = arith.extui %25 : vector<8x1xi1> to vector<8x1xi32>
      %27 = arith.sitofp %26 : vector<8x1xi32> to vector<8x1xf32>
      %28 = arith.mulf %22, %27 : vector<8x1xf32>
      %29 = vector.shape_cast %28 : vector<8x1xf32> to vector<1x8x1xf32>
      %cst_21 = arith.constant dense<0.000000e+00> : vector<1xf32>
      %30 = vector.multi_reduction <add>, %29, %cst_21 [1, 2] : vector<1x8x1xf32> to vector<1xf32>
      %31 = vector.shape_cast %30 : vector<1xf32> to vector<1x1x1xf32>
      %32 = vector.extract %31[0, 0, 0] : f32 from vector<1x1x1xf32>
      %33 = vector.shape_cast %27 : vector<8x1xf32> to vector<1x8x1xf32>
      %cst_22 = arith.constant dense<0.000000e+00> : vector<1xf32>
      %34 = vector.multi_reduction <add>, %33, %cst_22 [1, 2] : vector<1x8x1xf32> to vector<1xf32>
      %35 = vector.shape_cast %34 : vector<1xf32> to vector<1x1x1xf32>
      %36 = vector.extract %35[0, 0, 0] : f32 from vector<1x1x1xf32>
      %37 = tpu.iota {dimensions = array<i32: 2>} : vector<1x1x128xi32>
      %c0_i32_23 = arith.constant 0 : i32
      %38 = vector.broadcast %c0_i32_23 : i32 to vector<1x1x128xi32>
      %39 = arith.cmpi eq, %37, %38 : vector<1x1x128xi32>
      %cst_24 = arith.constant 0.000000e+00 : f32
      %40 = vector.broadcast %32 : f32 to vector<1x1x128xf32>
      %41 = vector.broadcast %cst_24 : f32 to vector<1x1x128xf32>
      %42 = arith.select %39, %40, %41 : vector<1x1x128xi1>, vector<1x1x128xf32>
      %c1_i32 = arith.constant 1 : i32
      %43 = vector.broadcast %c1_i32 : i32 to vector<1x1x128xi32>
      %44 = arith.cmpi eq, %37, %43 : vector<1x1x128xi32>
      %cst_25 = arith.constant 0.000000e+00 : f32
      %45 = vector.broadcast %36 : f32 to vector<1x1x128xf32>
      %46 = vector.broadcast %cst_25 : f32 to vector<1x1x128xf32>
      %47 = arith.select %44, %45, %46 : vector<1x1x128xi1>, vector<1x1x128xf32>
      %48 = arith.addf %42, %47 : vector<1x1x128xf32>
      %c0_26 = arith.constant 0 : index
      %c0_27 = arith.constant 0 : index
      %c0_28 = arith.constant 0 : index
      %49 = vector.load %arg4[%c0_26, %c0_27, %c0_28] : memref<1x1x128xf32, #tpu.memory_space<vmem>>, vector<1x1x128xf32>
      tpu.vector_store %arg4[%c0_26, %c0_27, %c0_28], %48 {strides = array<i32>} : memref<1x1x128xf32, #tpu.memory_space<vmem>>, vector<1x1x128xf32>,
    } else {
    }
    return
  }
  func.func @transform_0(%arg0: i32, %arg1: i32) -> (i32, i32) {
    %c0_i32 = arith.constant 0 : i32
    return %arg0, %arg1 : i32, i32
  }
  func.func @transform_1(%arg0: i32, %arg1: i32) -> (i32, i32) {
    %c0_i32 = arith.constant 0 : i32
    return %arg0, %arg1 : i32, i32
  }
  func.func @transform_2(%arg0: i32, %arg1: i32) -> (i32, i32, i32) {
    %c0_i32 = arith.constant 0 : i32
    %c0_i32_0 = arith.constant 0 : i32
    %c0_i32_1 = arith.constant 0 : i32
    return %arg0, %c0_i32, %c0_i32_0 : i32, i32, i32
  }
}

</mosaic_0001>

<bundles_post_ra>
// kernel: tpu_custom_call.1
= control target key start
LH: loop header
LB: loop body
LE: loop exit
PB: predicated region body
PF: predicated region fallthrough
CT: control target
= control target key end

     0   :  { %7 = vsyncpa [#allocation5], 0  ;;  %s262_s0 = inlined_call_operand.hbm [shape: f32[8,256], index: 0, kind: input, shape index: {}]   ;;  %s263_s1 = inlined_call_operand.hbm [shape: f32[8,256], index: 1, kind: input, shape index: {}]   ;;  %s264_s2 = inlined_call_operand.hbm [shape: f32[1,1,128], index: 2, kind: output, shape index: {}]  }
   0x1   :  { %8 = vsyncpa [#allocation8], 0 }
   0x2   :  { %9 = vsyncpa [#allocation6], 0  ;;  %s201_s9 = smov [#allocation4]   ;;  %s202_s11 = smov [#allocation7]  }
   0x3   :  { %s16_s10 = sshll.u32 %s201_s9, 4  ;;  %s26_s12 = sshll.u32 %s202_s11, 4  ;;  %s17_s10 = int_to_ptr.vmem [resolvable:$true] %s16_s10  ;;  %s27_s12 = int_to_ptr.vmem [resolvable:$true] %s26_s12 }
   0x4   :  { %s129_s15 = scalar_lea.hbm %s262_s0, 256 }
   0x5   :  { %p130_p0 = scmp.ne.s32.totalorder %s262_s0, %s129_s15  ;;  %p133_p1 = scmp.lt.u32.totalorder %s129_s15, %s262_s0 }
   0x7   :  { %p135_p2 = pnand %p133_p1, %p130_p0 }
   0x9   :  { %138 = shalt.err (!%p135_p2)
}
   0xa   :  { %s139_s20 = scalar_lea.vmem %s17_s10, 256  ;;  %p144_p4 = scmp.lt.s32.totalorder %s17_s10, %s17_s10 }
   0xb   :  { %p140_p3 = scmp.ne.s32.totalorder %s17_s10, %s139_s20  ;;  %p145_p5 = scmp.lt.s32.totalorder %s139_s20, %s139_s20 }
   0xd   :  { %p146_p6 = por %p145_p5, %p144_p4 }
   0xf   :  { %p147_p7 = pnand %p146_p6, %p140_p3 }
  0x11   :  { %150 = shalt.err (!%p147_p7)
}
  0x12   :  { %19 = dma.hbm_to_vmem [thread:$0]  %s262_s0, 256, %s17_s10, [#allocation5]  }
  0x13   :  { %s151_s25 = scalar_lea.hbm %s263_s1, 256 }
  0x14   :  { %p152_p8 = scmp.ne.s32.totalorder %s263_s1, %s151_s25  ;;  %p155_p9 = scmp.lt.u32.totalorder %s151_s25, %s263_s1 }
  0x16   :  { %p157_p10 = pnand %p155_p9, %p152_p8 }
  0x18   :  { %160 = shalt.err (!%p157_p10)
}
  0x19   :  { %s161_s30 = scalar_lea.vmem %s27_s12, 256  ;;  %p166_p12 = scmp.lt.s32.totalorder %s27_s12, %s27_s12 }
  0x1a   :  { %p162_p11 = scmp.ne.s32.totalorder %s27_s12, %s161_s30  ;;  %p167_p13 = scmp.lt.s32.totalorder %s161_s30, %s161_s30 }
  0x1c   :  { %p168_p0 = por %p167_p13, %p166_p12 }
  0x1e   :  { %p169_p1 = pnand %p168_p0, %p162_p11 }
  0x20   :  { %172 = shalt.err (!%p169_p1)
}
  0x21   :  { %29 = dma.hbm_to_vmem [thread:$0]  %s263_s1, 256, %s27_s12, [#allocation8]  }
  0x22   :  { %195 = dma.done.wait [#allocation5], 256  }
  0x23   :  { %196 = vsyncadd [#allocation5], 4294967040 }
  0x24   :  { %197 = dma.done.wait [#allocation8], 256  }
  0x25   :  { %198 = vsyncadd [#allocation8], 4294967040  ;;  %vm40_vm0 = vcmask 7168   ;;  %v203_v0 = vmov 0.0   ;;  %v43_v1 = vld [vmem:[#allocation4] sm:$0xff]  ;;  %v44_v2 = vld [vmem:[#allocation4 + $0x8] sm:$0xff]  ;;  %v94_v38 = vlaneseq }
  0x26   :  { %41 = vst.msk [vmem:[#allocation2] sm:$0xff] %vm40_vm0, %v203_v0  ;;  %42 = vst.msk [vmem:[#allocation3] sm:$0xff] %vm40_vm0, %v203_v0  ;;  %v45_v3 = vld [vmem:[#allocation7] sm:$0xff]  ;;  %v46_v4 = vld [vmem:[#allocation7 + $0x8] sm:$0xff]  ;;  %s204_s5 = smov [#allocation9]  }
  0x27   :  { %v47_v5 = vsub.f32 %v43_v1, %v45_v3  ;;  %v48_v6 = vsub.f32 %v44_v2, %v46_v4  ;;  %v59_v10 = vadd.f32 %v46_v4, %v45_v3  ;;  %v95_v39 = vand.u32 127, %v94_v38  ;;  %s110_s6 = sshll.u32 %s204_s5, 4  ;;  %s111_s6 = int_to_ptr.vmem [resolvable:$true] %s110_s6 }
  0x28   :  { %s173_s7 = scalar_lea.vmem %s111_s6, 16  ;;  %s177_s8 = scalar_lea.vmem %s111_s6, 32 }
  0x29   :  { %v50_v7 = vmul.f32 %v47_v5, %v47_v5  ;;  %v51_v8 = vmul.f32 %v48_v6, %v48_v6  ;;  %vm96_vm2 = vcmp.eq.s32.totalorder %v95_v39, 0  ;;  %vm99_vm3 = vcmp.eq.s32.totalorder %v95_v39, 1  ;;  %p174_p2 = scmp.ne.s32.totalorder %s111_s6, %s173_s7  ;;  %p178_p3 = scmp.lt.s32.totalorder %s111_s6, %s111_s6 }
  0x2a   :  { %p179_p4 = scmp.lt.s32.totalorder %s177_s8, %s173_s7 }
  0x2b   :  { %v52_v9 = vadd.f32 %v51_v8, %v50_v7 }
  0x2c   :  { %p180_p5 = por %p179_p4, %p178_p3 }
  0x2d   :  { %53 = vadd.xlane.f32.xlu0 %v52_v9  ;;  %v49_v11 = vld [vmem:[#allocation2] sm:$0xff]  ;;  %v58_v14 = vld [vmem:[#allocation3] sm:$0xff] }
  0x2e   :  { %p181_p6 = pnand %p180_p5, %p174_p2 }
  0x31   :  { %60 = vadd.xlane.f32.xlu0 %v59_v10 }
  0xba   :  { %v54_v12 = vpop.xlane.xlu0 %53 }
  0xbb   :  { %v55_v13 = vadd.f32 %v54_v12, %v49_v11 }
  0xbd   :  { %57 = vst.msk [vmem:[#allocation2] sm:$0xff] %vm40_vm0, %v55_v13 }
  0xbe   :  { %v61_v15 = vpop.xlane.xlu0 %60 }
  0xbf   :  { %v62_v16 = vadd.f32 %v61_v15, %v58_v14 }
  0xc1   :  { %63 = vst.msk [vmem:[#allocation3] sm:$0xff] %vm40_vm0, %v62_v16 }
  0xc4   :  { %v67_v17 = vld [vmem:[#allocation2] sm:$0xff] }
  0xc5   :  { %v68_v19 = vmul.f32 0.00390625, %v67_v17 }
  0xc8   :  { %v69_v18 = vld [vmem:[#allocation3] sm:$0xff] }
  0xc9   :  { %vm70_vm1 = vcmp.gt.f32.partialorder %v69_v18, 0.0 }
  0xca   :  { %v120_v20 = vsel %vm70_vm1, 1.0, %v203_v0 }
  0xcb   :  { %v73_v21 = vmul.f32 %v120_v20, %v68_v19  ;;  %v84_v23 = vsel %vm40_vm0, %v120_v20, 0.0 }
  0xcd   :  { %v74_v22 = vsel %vm40_vm0, %v73_v21, 0.0 }
  0xce   :  { %75 = vadd.xlane.f32.xlu1 %v74_v22 }
  0xd2   :  { %85 = vadd.xlane.f32.xlu1 %v84_v23 }
 0x15b   :  { %v76_v24 = vpop.xlane.xlu1 %75 }
 0x15c   :  { %v77_v25 = vrot.slane %v76_v24, 4 }
 0x15e   :  { %v78_v26 = vadd.f32 %v77_v25, %v76_v24 }
 0x15f   :  { %v86_v27 = vpop.xlane.xlu1 %85 }
 0x160   :  { %v79_v28 = vrot.slane %v78_v26, 2  ;;  %v87_v29 = vrot.slane %v86_v27, 4 }
 0x162   :  { %v88_v30 = vadd.f32 %v87_v29, %v86_v27  ;;  %v80_v31 = vadd.f32 %v79_v28, %v78_v26 }
 0x164   :  { %v89_v32 = vrot.slane %v88_v30, 2  ;;  %v81_v33 = vrot.slane %v80_v31, 1 }
 0x166   :  { %v90_v34 = vadd.f32 %v89_v32, %v88_v30  ;;  %v82_v35 = vadd.f32 %v81_v33, %v80_v31 }
 0x168   :  { %121 = vpush %v82_v35  ;;  %v91_v36 = vrot.slane %v90_v34, 1 }
 0x16a   :  { %v92_v37 = vadd.f32 %v91_v36, %v90_v34 }
 0x16c   :  { %123 = vpush %v92_v37 }
 0x199   :  { %s122_s1 = spop %121 }
 0x19a   :  { %v97_v40 = vstv %s122_s1 }
 0x19b   :  { %v98_v42 = vsel %vm96_vm2, %v97_v40, 0.0 }
 0x19d   :  { %s124_s4 = spop %123 }
 0x19e   :  { %v100_v41 = vstv %s124_s4 }
 0x19f   :  { %v101_v43 = vsel %vm99_vm3, %v100_v41, 0.0 }
 0x1a0   :  { %v102_v44 = vadd.f32 %v101_v43, %v98_v42 }
 0x1a2   :  { %103 = vst [vmem:[#allocation9] sm:$0x1] %v102_v44 }
 0x1a3   :  { %184 = shalt.err (!%p181_p6)
}
 0x1a4   :  { %s185_s11 = scalar_lea.hbm %s264_s2, 16 }
 0x1a5   :  { %p186_p7 = scmp.ne.s32.totalorder %s264_s2, %s185_s11  ;;  %p189_p8 = scmp.lt.u32.totalorder %s185_s11, %s264_s2 }
 0x1a7   :  { %p191_p9 = pnand %p189_p8, %p186_p7 }
 0x1a9   :  { %194 = shalt.err (!%p191_p9)
}
 0x1aa   :  { %113 = dma.vmem_to_hbm [thread:$0]  %s111_s6, 16, %s264_s2, [#allocation6]  }
 0x1ab   :  { %199 = dma.done.wait [#allocation6], 16  }
 0x1ac   :  { %200 = vsyncadd [#allocation6], 4294967280 }
 0x1ad   :  { %117 = vsyncpa [#allocation5], 1 }
 0x1ae   :  { %118 = vsyncpa [#allocation8], 1 }
 0x1af   :  { %119 = vsyncpa [#allocation6], 1 }

</bundles_post_ra>
